<compile_context>
chip_gen: v7x
topology: tpu7x:2x2x1
jax: 0.10.0
libtpu: 0.0.40
codegen_flags: <defaults>
</compile_context>

<pallas_src>
import functools

import jax
import jax.numpy as jnp
import numpy as np
from jax.experimental import pallas as pl
from jax.experimental.pallas import tpu as pltpu


def _round_up(x, m):
    return ((x + m - 1) // m) * m


def _data_loss_kernel(batch_size, dom_offset, needs_mask,
                      emb_ref, idx_ref, tab_ref, partial_ref):
    """One batch tile: normalize, fused one-hot gather, squared error, partial sum."""
    i = pl.program_id(0)
    TB, E = emb_ref.shape
    T_pad = tab_ref.shape[0]

    emb = emb_ref[...].astype(jnp.float32)                          # (TB, E)
    idx = idx_ref[...]                                              # (TB, 2) int32
    cls_ids = idx[:, 0:1]                                           # (TB, 1)
    dom_ids = idx[:, 1:2] + dom_offset                              # (TB, 1)

    if needs_mask:
        # Neutralize garbage rows of the partial edge block BEFORE the rsqrt so
        # no NaN/Inf can leak into the masked sums.
        row = jax.lax.broadcasted_iota(jnp.int32, (TB, 1), 0) + i * TB
        valid = row < batch_size                                    # (TB, 1) bool
        emb = jnp.where(valid, emb, 1.0)

    # 1/||emb||  (rsqrt -> EUP slot); scale is folded into the diff below.
    inv_norm = jax.lax.rsqrt(jnp.sum(emb * emb, axis=1, keepdims=True))   # (TB, 1)

    # Fused one-hot over [class rows | domain rows] of the combined table.
    col = jax.lax.broadcasted_iota(jnp.int32, (TB, T_pad), 1)
    onehot = ((col == cls_ids) | (col == dom_ids)).astype(jnp.float32)    # (TB, T_pad)

    # class[c] + offset + domain[d] in a single MXU dot (offset folded into table).
    pred = jnp.dot(onehot, tab_ref[...], preferred_element_type=jnp.float32)  # (TB, E)

    diff = pred - emb * inv_norm
    if needs_mask:
        diff = jnp.where(valid, diff, 0.0)
    sq = diff * diff

    if TB % 8 == 0:
        # Fold rows in groups of 8 (VPU adds only) -> unmasked lane-dense store.
        partial_ref[...] = sq.reshape(TB // 8, 8, E).sum(axis=0, keepdims=True)
    else:
        # Tiny-batch path (TB == B < 8): single cross-sublane reduction.
        partial_ref[...] = sq.sum(axis=0, keepdims=True)[None]


def disentanglement_loss(embeddings, gt_classes, gt_domains,
                         class_components, domain_components, offset_component,
                         do_ortho=True):
    B, E = embeddings.shape
    C = class_components.shape[0]
    D = domain_components.shape[0]
    emb_itemsize = jnp.dtype(embeddings.dtype).itemsize

    # --- fused component table: [class + offset ; domain ; zero-pad]  (tiny) ---
    T = C + D
    T_pad = _round_up(T, 8)
    table = jnp.zeros((T_pad, E), jnp.float32)
    table = table.at[:C].set(class_components.astype(jnp.float32)
                             + offset_component.astype(jnp.float32))
    table = table.at[C:T].set(domain_components.astype(jnp.float32))

    # --- packed (B, 2) int32 indices (single small per-step DMA) ---
    idx = jnp.stack([gt_classes.astype(jnp.int32),
                     gt_domains.astype(jnp.int32)], axis=1)

    # --- batch tile size: >=2-4 MiB of embeddings per step, under a VMEM budget ---
    tile_target_bytes = 4 * 1024 * 1024
    vmem_budget = 24 * 1024 * 1024
    fixed_bytes = 2 * T_pad * E * 4 + 2 * 8 * E * 4          # table (2x, conservative) + out
    per_row_bytes = (2 * E * emb_itemsize                     # emb tile, double-buffered
                     + 2 * 128 * 4                            # (TB,2) idx tile, lane-padded, 2x
                     + (6 * E + 2 * T_pad) * 4)               # ~live f32 temporaries
    tb_target = max(8, ((tile_target_bytes // (E * emb_itemsize)) // 8) * 8)
    tb_vmem = max(8, ((max(vmem_budget - fixed_bytes, 0) // per_row_bytes) // 8) * 8)
    if B < 8:
        TB = B                                                # full-dim block exception
    else:
        TB = max(8, min(tb_target, tb_vmem, (B // 8) * 8, 8192))

    n_chunks = pl.cdiv(B, TB)
    needs_mask = (B % TB) != 0
    R = 8 if TB % 8 == 0 else 1

    vmem_estimate = fixed_bytes + per_row_bytes * TB
    vmem_limit = int(min(48 * 1024 * 1024, max(2 * vmem_estimate, 16 * 1024 * 1024)))

    kernel = functools.partial(_data_loss_kernel, B, C, needs_mask)

    partials = pl.pallas_call(
        kernel,
        grid=(n_chunks,),
        in_specs=[
            pl.BlockSpec((TB, E), lambda i: (i, 0)),          # embeddings tile (streamed)
            pl.BlockSpec((TB, 2), lambda i: (i, 0)),          # packed class/domain indices
            pl.BlockSpec((T_pad, E), lambda i: (0, 0)),       # resident fused component table
        ],
        out_specs=pl.BlockSpec((1, R, E), lambda i: (i, 0, 0)),
        out_shape=jax.ShapeDtypeStruct((n_chunks, R, E), jnp.float32),
        compiler_params=pltpu.CompilerParams(
            dimension_semantics=("parallel",),
            vmem_limit_bytes=vmem_limit),
    )(embeddings, idx, table)

    # Mean over the TRUE batch size (padding rows were zeroed in-kernel).
    loss = jnp.sum(partials) / B

    if do_ortho:
        # Tiny (C,E)@(E,D) term -- plain XLA, no second pallas_call.
        A = class_components.astype(jnp.float32)
        Bm = domain_components.astype(jnp.float32)
        A = A * jax.lax.rsqrt(jnp.sum(A * A, axis=1, keepdims=True))
        Bm = Bm * jax.lax.rsqrt(jnp.sum(Bm * Bm, axis=1, keepdims=True))
        cos = A @ Bm.T
        loss = loss + jnp.mean(cos * cos)
    return loss


def reference_loss(embeddings, gt_classes, gt_domains,
                   class_components, domain_components, offset_component,
                   do_ortho=True):
    emb = embeddings.astype(jnp.float32)
    emb = emb / jnp.linalg.norm(emb, axis=1, keepdims=True)
    pred = (class_components[gt_classes] + domain_components[gt_domains]
            + offset_component)
    losses = jnp.sum(jnp.square(pred - emb), axis=1)
    loss = jnp.mean(losses)
    if do_ortho:
        A = class_components / jnp.linalg.norm(class_components, axis=1, keepdims=True)
        Bm = domain_components / jnp.linalg.norm(domain_components, axis=1, keepdims=True)
        cos = A @ Bm.T
        loss = loss + jnp.mean(jnp.square(cos))
    return loss


if __name__ == "__main__":
    E = 128                 # embedding_size (one lane width)
    C, D = 5, 3             # num_classes, num_domains

    key = jax.random.PRNGKey(0)
    k_emb, k_cls, k_dom, k_c, k_d, k_o = jax.random.split(key, 6)

    # Deterministic synthetic parameters.  (The PyTorch module initializes these
    # to zeros when no dataset/backbone is given, which makes the ortho-loss
    # normalization degenerate (0/0); use small random values instead.)
    class_components = 0.1 * jax.random.normal(k_c, (C, E), dtype=jnp.float32)
    domain_components = 0.1 * jax.random.normal(k_d, (D, E), dtype=jnp.float32)
    offset_component = 0.1 * jax.random.normal(k_o, (1, E), dtype=jnp.float32)

    cases = [
        (12, jnp.float32),    # ragged batch -> partial edge block + in-kernel masking
        (16, jnp.float32),    # exact multiple of the tile -> unmasked fast path
        (5,  jnp.float32),    # tiny batch (< 8 rows) full-block path
        (12, jnp.bfloat16),   # bf16 embeddings stream (cast to f32 in-VMEM)
    ]

    for B, dt in cases:
        kb = jax.random.fold_in(k_emb, B)
        embeddings = jax.random.normal(kb, (B, E), dtype=jnp.float32).astype(dt)
        gt_classes = jax.random.randint(jax.random.fold_in(k_cls, B), (B,), 0, C,
                                        dtype=jnp.int32)
        gt_domains = jax.random.randint(jax.random.fold_in(k_dom, B), (B,), 0, D,
                                        dtype=jnp.int32)
        for do_ortho in (True, False):
            loss = disentanglement_loss(embeddings, gt_classes, gt_domains,
                                        class_components, domain_components,
                                        offset_component, do_ortho=do_ortho)
            loss = jax.block_until_ready(loss)
            ref = reference_loss(embeddings, gt_classes, gt_domains,
                                 class_components, domain_components,
                                 offset_component, do_ortho=do_ortho)
            np.testing.assert_allclose(np.asarray(loss), np.asarray(ref),
                                       rtol=2e-3, atol=2e-3)

    print("KERNEL_OK")
</pallas_src>

<mosaic_0001>
module attributes {stable_mosaic.version = 11 : i64} {
  func.func @_data_loss_kernel(%arg0: i32, %arg1: memref<8x128xf32, #tpu.memory_space<vmem>>, %arg2: memref<8x2xi32, #tpu.memory_space<vmem>>, %arg3: memref<8x128xf32, #tpu.memory_space<vmem>>, %arg4: memref<1x8x128xf32, #tpu.memory_space<vmem>>) attributes {dimension_semantics = [#tpu.dimension_semantics<parallel>], iteration_bounds = array<i64: 2>, scalar_prefetch = 0 : i64, scratch_operands = 0 : i64, tpu.core_type = #tpu.core_type<tc>, window_params = [{transform_indices = @transform_0, window_bounds = array<i64: 8, 128>}, {transform_indices = @transform_1, window_bounds = array<i64: 8, 2>}, {pipeline_mode = #tpu.pipeline_mode<synchronous>, transform_indices = @transform_2, window_bounds = array<i64: 8, 128>}, {transform_indices = @transform_3, window_bounds = array<i64: 1, 8, 128>}]} {
    %c0 = arith.constant 0 : index
    %c0_0 = arith.constant 0 : index
    %0 = vector.load %arg1[%c0, %c0_0] : memref<8x128xf32, #tpu.memory_space<vmem>>, vector<8x128xf32>
    %c0_1 = arith.constant 0 : index
    %c0_2 = arith.constant 0 : index
    %1 = vector.load %arg2[%c0_1, %c0_2] : memref<8x2xi32, #tpu.memory_space<vmem>>, vector<8x2xi32>
    %2 = vector.extract_strided_slice %1 {offsets = [0, 0], sizes = [8, 1], strides = [1, 1]} : vector<8x2xi32> to vector<8x1xi32>
    %3 = vector.extract_strided_slice %1 {offsets = [0, 1], sizes = [8, 1], strides = [1, 1]} : vector<8x2xi32> to vector<8x1xi32>
    %c5_i32 = arith.constant 5 : i32
    %4 = vector.broadcast %c5_i32 : i32 to vector<8x1xi32>
    %5 = arith.addi %3, %4 : vector<8x1xi32>
    %6 = tpu.iota {dimensions = array<i32: 0>} : vector<8x1xi32>
    %c8_i32 = arith.constant 8 : i32
    %7 = arith.muli %arg0, %c8_i32 : i32
    %8 = vector.broadcast %7 : i32 to vector<8x1xi32>
    %9 = arith.addi %6, %8 : vector<8x1xi32>
    %c12_i32 = arith.constant 12 : i32
    %10 = vector.broadcast %c12_i32 : i32 to vector<8x1xi32>
    %11 = arith.cmpi slt, %9, %10 : vector<8x1xi32>
    %cst = arith.constant 1.000000e+00 : f32
    %12 = vector.shape_cast %11 : vector<8x1xi1> to vector<8x1xi1>
    %13 = vector.broadcast %12 : vector<8x1xi1> to vector<8x128xi1>
    %14 = vector.broadcast %cst : f32 to vector<8x128xf32>
    %15 = arith.select %13, %0, %14 : vector<8x128xi1>, vector<8x128xf32>
    %16 = arith.mulf %15, %15 : vector<8x128xf32>
    %cst_3 = arith.constant dense<0.000000e+00> : vector<8xf32>
    %17 = vector.multi_reduction <add>, %16, %cst_3 [1] : vector<8x128xf32> to vector<8xf32>
    %18 = vector.shape_cast %17 : vector<8xf32> to vector<8x1xf32>
    %19 = math.rsqrt %18 : vector<8x1xf32>
    %20 = tpu.iota {dimensions = array<i32: 1>} : vector<8x8xi32>
    %21 = vector.broadcast %2 : vector<8x1xi32> to vector<8x8xi32>
    %22 = arith.cmpi eq, %20, %21 : vector<8x8xi32>
    %23 = vector.broadcast %5 : vector<8x1xi32> to vector<8x8xi32>
    %24 = arith.cmpi eq, %20, %23 : vector<8x8xi32>
    %25 = arith.ori %22, %24 : vector<8x8xi1>
    %26 = arith.extui %25 : vector<8x8xi1> to vector<8x8xi32>
    %27 = arith.sitofp %26 : vector<8x8xi32> to vector<8x8xf32>
    %c0_4 = arith.constant 0 : index
    %c0_5 = arith.constant 0 : index
    %28 = vector.load %arg3[%c0_4, %c0_5] : memref<8x128xf32, #tpu.memory_space<vmem>>, vector<8x128xf32>
    %cst_6 = arith.constant dense<0.000000e+00> : vector<8x128xf32>
    %29 = tpu.matmul %27, %28, %cst_6 {dimension_numbers = #tpu.dot_dimension_numbers<[1], [0], [0], [1], [0, 0, 1, 1], [], []>} : vector<8x8xf32>, vector<8x128xf32>, vector<8x128xf32> -> vector<8x128xf32>
    %30 = vector.broadcast %19 : vector<8x1xf32> to vector<8x128xf32>
    %31 = arith.mulf %15, %30 : vector<8x128xf32>
    %32 = arith.subf %29, %31 : vector<8x128xf32>
    %cst_7 = arith.constant 0.000000e+00 : f32
    %33 = vector.shape_cast %11 : vector<8x1xi1> to vector<8x1xi1>
    %34 = vector.broadcast %33 : vector<8x1xi1> to vector<8x128xi1>
    %35 = vector.broadcast %cst_7 : f32 to vector<8x128xf32>
    %36 = arith.select %34, %32, %35 : vector<8x128xi1>, vector<8x128xf32>
    %37 = arith.mulf %36, %36 : vector<8x128xf32>
    %38 = vector.shape_cast %37 : vector<8x128xf32> to vector<1x8x128xf32>
    %cst_8 = arith.constant dense<0.000000e+00> : vector<8x128xf32>
    %39 = vector.multi_reduction <add>, %38, %cst_8 [0] : vector<1x8x128xf32> to vector<8x128xf32>
    %40 = vector.shape_cast %39 : vector<8x128xf32> to vector<1x8x128xf32>
    %c0_9 = arith.constant 0 : index
    %c0_10 = arith.constant 0 : index
    %c0_11 = arith.constant 0 : index
    %41 = vector.load %arg4[%c0_9, %c0_10, %c0_11] : memref<1x8x128xf32, #tpu.memory_space<vmem>>, vector<1x8x128xf32>
    tpu.vector_store %arg4[%c0_9, %c0_10, %c0_11], %40 {strides = array<i32>} : memref<1x8x128xf32, #tpu.memory_space<vmem>>, vector<1x8x128xf32>,
    return
  }
  func.func @transform_0(%arg0: i32) -> (i32, i32) {
    %c0_i32 = arith.constant 0 : i32
    %c0_i32_0 = arith.constant 0 : i32
    return %arg0, %c0_i32 : i32, i32
  }
  func.func @transform_1(%arg0: i32) -> (i32, i32) {
    %c0_i32 = arith.constant 0 : i32
    %c0_i32_0 = arith.constant 0 : i32
    return %arg0, %c0_i32 : i32, i32
  }
  func.func @transform_2(%arg0: i32) -> (i32, i32) {
    %c0_i32 = arith.constant 0 : i32
    %c0_i32_0 = arith.constant 0 : i32
    %c0_i32_1 = arith.constant 0 : i32
    return %c0_i32, %c0_i32_0 : i32, i32
  }
  func.func @transform_3(%arg0: i32) -> (i32, i32, i32) {
    %c0_i32 = arith.constant 0 : i32
    %c0_i32_0 = arith.constant 0 : i32
    %c0_i32_1 = arith.constant 0 : i32
    return %arg0, %c0_i32, %c0_i32_0 : i32, i32, i32
  }
}

</mosaic_0001>

<bundles_post_ra>
// kernel: tpu_custom_call.1
= control target key start
LH: loop header
LB: loop body
LE: loop exit
PB: predicated region body
PF: predicated region fallthrough
CT: control target
= control target key end

     0   :  { %8 = vsyncpa [#allocation3], 0  ;;  %s644_s0 = inlined_call_operand.vmem [shape: f32[12,128], index: 0, kind: input, shape index: {}]   ;;  %s645_s1 = inlined_call_operand.vmem [shape: s32[12,2], index: 1, kind: input, shape index: {}]   ;;  %s646_s2 = inlined_call_operand.vmem [shape: f32[8,128], index: 2, kind: input, shape index: {}]   ;;  %s647_s3 = inlined_call_operand.hbm [shape: f32[2,8,128], index: 3, kind: output, shape index: {}]  }
   0x1   :  { %10 = vsyncpa [#allocation3 + $0x1], 0  ;;  %s535_s12 = smov 0   ;;  %s537_s13 = smov 0  }
   0x2   :  { %s539_s14 = smov 0   ;;  %s541_s15 = smov 0  }
   0x3 LB: > { %s556_s16 = sadd.s32 4294967295, %s508_s15   ;;  %s378_s17 = sadd.s32 4294967294, %s508_s15   ;;  %s508_s15 = sphi %s541_s15, %s653_s15   ;;  %s504_s14 = sphi %s539_s14, %s652_s14   ;;  %s500_s13 = sphi %s537_s13, %s651_s13   ;;  %s496_s12 = sphi %s535_s12, %s650_s12  }
   0x4   : > { %s560_s18 = sadd.s32 1, %s508_s15   ;;  %s96_s19 = sadd.s32 1, %s504_s14 }
   0x5   : > { %s93_s20 = ssub.s32 %s508_s15, %s560_s18  ;;  %p106_p0 = scmp.ne.s32.totalorder %s504_s14, %s500_s13 }
   0x6   : > { %p94_p1 = scmp.eq.s32.totalorder %s93_s20, 0  ;;  %p107_p2 = scmp.eq.s32.totalorder %s556_s16, 1 }
   0x7   : > { %p112_p3 = scmp.ne.s32.totalorder %s500_s13, %s496_s12  ;;  %p113_p4 = scmp.eq.s32.totalorder %s378_s17, 1 }
   0x8   : > { %s571_s21 = scalar_select %p94_p1, %s504_s14, %s96_s19  }
   0x9   : > { %p573_p5 = por %p107_p2, %p106_p0  ;;  %p577_p6 = por %p113_p4, %p112_p3 }
   0xa   : > { %p381_p7 = scmp.ge.s32.totalorder %s508_s15, 1  ;;  %p148_p8 = scmp.lt.s32.totalorder %s508_s15, 3 }
   0xc   : > { %p149_p9 = pnand %p381_p7, %p148_p8 }
   0xd   : > { %p175_p10 = scmp.lt.s32.totalorder (!%p149_p9), %s556_s16, 1  ;;  %v510_v0 = vmov (!%p149_p9), 0   ;;  %v511_v3 = vmov (!%p149_p9), 1   ;;  %v186_v4 = vlaneseq (!%p149_p9)  ;;  %v512_v5 = vmov (!%p149_p9), 0.0   ;;  %v212_v6 = vld [vmem:[%s646_s2] sm:$0xff] (!%p149_p9)  ;;  %s385_s7 = sshll.u32 (!%p149_p9), %s556_s16, 3 }
   0xe   : > { %152 = sbr.rel (%p149_p9) target bundleno = 393 (0x189), region = 32  ;;  %442 = vset.pattern.permute.xlu0 (!%p149_p9), %v510_v0  ;;  %394 = vmatprep.subr.mxu0 (!%p149_p9), %v512_v5  ;;  %vm513_vm0 = vmmov (!%p149_p9), 0   ;;  %v189_v8 = vstv (!%p149_p9), %s385_s7  ;;  %vm213_vm4 = vcmask (!%p149_p9), 64512   ;;  %s172_s8 = sand.u32 (!%p149_p9), 1, %s500_s13  }
   0xf   : > { %395 = vmatpush3.msra.mxu0 (!%p149_p9), %v212_v6  ;;  %396 = vmatprep.mubr.msk.f32.mxu0 (!%p149_p9), %vm513_vm0, %v512_v5  ;;  %v187_v7 = vshrl.u32 (!%p149_p9), %v186_v4, 7  ;;  %v200_v14 = vand.u32 (!%p149_p9), 127, %v186_v4  ;;  %s382_s9 = sshll.u32 (!%p149_p9), %s172_s8, 3  ;;  %s389_s10 = sshll.u32 (!%p149_p9), %s556_s16, 7 }
  0x10   : > { %s174_s11 = scalar_lea.vmem (!%p149_p9), [#allocation2], %s382_s9 }
  0x11   : > { %v190_v10 = vadd.s32 (!%p149_p9), %v189_v8, %v187_v7  ;;  %s307_s17 = sshll.u32 (!%p149_p9), %s174_s11, 4  ;;  %s604_s17 = int_to_ptr.vmem [resolvable:$true] %s307_s17 }
  0x12   : > { %s446_s26 = scalar_lea.vmem (!%p149_p9), %s604_s17, 128 }
  0x13   : > { %vm191_vm1 = vcmp.lt.s32.totalorder (!%p149_p9), %v190_v10, 12  ;;  %p447_p11 = scmp.ne.s32.totalorder (!%p149_p9), %s604_s17, %s446_s26 }
  0x15   : > { %s176_s24 = scalar_select %p175_p10, %s556_s16, 1 }
  0x16   : > { %p448_p12 = pnand %p447_p11, %p573_p5  ;;  %s514_s16 = smov [#allocation2]  }
  0x17   : > { %s383_s25 = sshll.u32 %s176_s24, 3  ;;  %s602_s24 = scalar_lea.hbm %s647_s3, %s389_s10 }
  0x18   : > { %s182_s28 = scalar_lea.vmem %s645_s1, %s383_s25  ;;  %s178_s6 = scalar_lea.vmem %s644_s0, %s383_s25 }
  0x19   : > { %v184_v1 = vld [vmem:[%s182_s28] sm:$0xff]  ;;  %s294_s25 = scalar_lea.sflag [#allocation3], %s172_s8  ;;  %p449_p13 = pneg %p448_p12 }
  0x1a   : > { %202 = vperm.xlu0 %442, %v184_v1   ;;  %v185_v2 = vadd.s32 5, %v184_v1  ;;  %v183_v9 = vld [vmem:[%s178_s6] sm:$0xff]  ;;  %s450_s27 = sshll.u32 %s514_s16, 4  ;;  %s451_s27 = int_to_ptr.vmem [resolvable:$false] %s450_s27 }
  0x1b   : > { %v194_v11 = vsel %vm191_vm1, %v183_v9, 1.0  ;;  %s452_s28 = scalar_lea.vmem %s451_s27, 256  ;;  %p453_p0 = scmp.lt.s32.totalorder %s604_s17, %s451_s27 }
  0x1c   : > { %v195_v12 = vmul.f32 %v194_v11, %v194_v11  ;;  %p454_p1 = scmp.lt.s32.totalorder %s452_s28, %s446_s26 }
  0x1e   : > { %443 = vset.pattern.permute.xlu0 %v511_v3  ;;  %196 = vadd.xlane.f32.xlu1 %v195_v12  ;;  %p455_p2 = por %p454_p1, %p453_p0 }
  0x1f   : > { %206 = vperm.xlu0 %443, %v185_v2  }
  0x20   : > { %p456_p3 = pnand %p455_p2, %p449_p13 }
  0x99   : > { %v203_v13 = vpop.permute.xlu0 %202 }
  0x9a   : > { %vm204_vm2 = vcmp.eq.s32.totalorder %v200_v14, %v203_v13 }
  0x9e   : > { %v207_v15 = vpop.permute.xlu0 %206 }
  0x9f   : > { %vm208_vm3 = vcmp.eq.s32.totalorder %v200_v14, %v207_v15 }
  0xa0   : > { %vm209_vm5 = vmor %vm204_vm2, %vm208_vm3 }
  0xa1   : > { %v386_v16 = vsel %vm209_vm5, 1.0, %v512_v5 }
  0xa2   : > { %397 = vmatmul.mubr.msk.f32.vlgmr.msra.gmra.mrb[0].mxu0 %vm213_vm4, %v386_v16 }
  0xab   : > { %v197_v17 = vpop.xlane.xlu1 %196 }
  0xac   : > { %444 = vrsqrt.f32 %v197_v17 }
  0xb6   : > { %v445_v18 = vpop.eup %444 }
  0xb7   : > { %v287_v19 = vmul.f32 %v445_v18, %v194_v11 }
 0x175   : > { %v283_v20 = vpop.f32.mrb[0].mxu0 }
 0x176   : > { %v288_v21 = vsub.f32 %v283_v20, %v287_v19  ;;  %v398_v22 = vpop.f32.mrb[1].mxu0 }
 0x178   : > { %v289_v23 = vsel %vm191_vm1, %v288_v21, 0.0 }
 0x179   : > { %v290_v24 = vmul.f32 %v289_v23, %v289_v23 }
 0x17b   : > { %292 = vst [vmem:[%s174_s11] sm:$0xff] %v290_v24 }
 0x17c   : > { %459 = shalt.err (!%p456_p3)
}
 0x17d   : > { %s460_s29 = scalar_lea.hbm %s602_s24, 128  ;;  %s464_s5 = scalar_lea.hbm %s647_s3, 256 }
 0x17e   : > { %p461_p4 = scmp.ne.s32.totalorder %s602_s24, %s460_s29  ;;  %p465_p9 = scmp.lt.u32.totalorder %s602_s24, %s647_s3 }
 0x17f   : > { %p466_p10 = scmp.lt.u32.totalorder %s464_s5, %s460_s29  ;;  %p468_p12 = scmp.lt.u32.totalorder %s460_s29, %s602_s24 }
 0x180   : > { %p462_p7 = pnand %p461_p4, %p573_p5 }
 0x181   : > { %p467_p11 = por %p466_p10, %p465_p9 }
 0x182   : > { %p463_p8 = pneg %p462_p7 }
 0x183   : > { %p469_p13 = por %p468_p12, %p467_p11 }
 0x185   : > { %p470_p0 = pnand %p469_p13, %p463_p8 }
 0x187   : > { %473 = shalt.err (!%p470_p0)
}
 0x188   : > { %399 = dma.vmem_to_hbm [thread:$0]  (%p573_p5), %s604_s17, 128, %s602_s24, %s294_s25  }
 0x189 PF: > { %p405_p1 = scmp.ge.s32.totalorder %s508_s15, 2  ;;  %s319_s8 = sand.u32 1, %s496_s12  }
 0x18a   : > { %s320_s9 = scalar_lea.sflag [#allocation3], %s319_s8 }
 0x18b   : > { %p402_p2 = pnand %p405_p1, %p577_p6 }
 0x18d   : > { %491 = dma.done.wait (!%p402_p2), %s320_s9, 128  }
 0x18e   : > { %493 = vsyncadd (!%p402_p2), %s320_s9, 4294967168  ;;  %p13_p3 = scmp.ge.s32.totalorder %s560_s18, 4   ;;  %s650_s12 = smov %s500_s13 }
 0x18f   : > { %s651_s13 = smov %s504_s14  ;;  %s652_s14 = smov %s571_s21 }
 0x190   : > { %s653_s15 = smov %s560_s18  ;;  %15 = sbr.rel (!%p13_p3) target bundleno = 3 (0x3), region = 70 }
 0x197   :  { %325 = vsyncpa [#allocation3], 1 }
 0x198   :  { %327 = vsyncpa [#allocation3 + $0x1], 1 }

</bundles_post_ra>
